<compile_context>
chip_gen: v7x
topology: tpu7x:2x2x1
jax: 0.10.0
libtpu: 0.0.40
codegen_flags: <defaults>
</compile_context>

<pallas_src>
import functools

import jax
import jax.numpy as jnp
from jax.experimental import pallas as pl
from jax.experimental.pallas import tpu as pltpu

_EPS = 1e-5
_LANE = 128
_SUBLANE = 8


def _round_up(a, b):
    return (a + b - 1) // b * b


def _pad2d(a, rows, cols):
    return jnp.pad(a, ((0, rows - a.shape[0]), (0, cols - a.shape[1])))


# ----------------------------------------------------------------------------
# Generation-dependent budgets (v7x: 64 MiB physical VMEM, v5e/v6e: 128 MiB)
# ----------------------------------------------------------------------------
def _detect_vmem_capacity_bytes():
    try:
        return int(pltpu.get_tpu_info().vmem_capacity_bytes)
    except Exception:          # no TPU / older API: assume the smaller (v7x) budget
        return 64 * 1024 * 1024


_VMEM_CAPACITY_BYTES = _detect_vmem_capacity_bytes()
# Scoped-VMEM limit: ~half of physical capacity, clamped to [32, 96] MiB.
_VMEM_LIMIT_BYTES = min(max(_VMEM_CAPACITY_BYTES // 2, 32 * 1024 * 1024), 96 * 1024 * 1024)
# Larger M tiles amortize the ~0.35us/grid-step overhead on 128-MiB chips; stay at 512 on v7x.
_DEFAULT_TILE_M = 1024 if _VMEM_CAPACITY_BYTES >= 96 * 1024 * 1024 else 512

_COMPILER_PARAMS = pltpu.CompilerParams(
    dimension_semantics=("parallel",),
    vmem_limit_bytes=_VMEM_LIMIT_BYTES)


def _choose_tiles(m, tile_m):
    """Pick (tm, n_tiles, m_pad): tm multiple of 8, even n_tiles >= 2 (v7x megacore split)."""
    m8 = _round_up(m, _SUBLANE)
    n_tiles = max(2, pl.cdiv(m8, tile_m))
    n_tiles = _round_up(n_tiles, 2)
    tm = _round_up(pl.cdiv(m8, n_tiles), _SUBLANE)
    return tm, n_tiles, tm * n_tiles


# ----------------------------------------------------------------------------
# Pass 1 kernel: tiled bf16 MXU matmul (f32 acc) -> bf16 y + f32 BN stat partials
# ----------------------------------------------------------------------------
def _matmul_stats_kernel(p_ref, w_ref, y_ref, stats_ref):
    # (TILE_M, Kp) bf16 @ (Kp, Cp) bf16 -> f32 accumulator.
    acc = jnp.dot(p_ref[...], w_ref[...], preferred_element_type=jnp.float32)
    y_ref[...] = acc.astype(y_ref.dtype)                 # bf16 intermediate to HBM (half traffic)
    # Column partials from the f32 accumulator (padded zero rows contribute nothing).
    col_sum = jnp.sum(acc, axis=0)                       # (Cp,)
    col_ssq = jnp.sum(acc * acc, axis=0)                 # (Cp,)
    stats_ref[...] = jnp.stack([col_sum, col_ssq], axis=0)[None, :, :]   # (1, 2, Cp)


# ----------------------------------------------------------------------------
# Pass 2 kernel: tiled folded-BN epilogue (+ optional residual, + optional ReLU)
# ----------------------------------------------------------------------------
def _make_epilogue_kernel(apply_relu: bool, has_residual: bool):
    def compute(y_ref, scale_ref, shift_ref, r_ref, o_ref):
        v = y_ref[...].astype(jnp.float32) * scale_ref[...] + shift_ref[...]   # folded BN
        if has_residual:
            v = v + r_ref[...].astype(jnp.float32)
        if apply_relu:
            v = jnp.maximum(v, 0.0)
        o_ref[...] = v.astype(o_ref.dtype)

    if has_residual:
        def kernel(y_ref, scale_ref, shift_ref, r_ref, o_ref):
            compute(y_ref, scale_ref, shift_ref, r_ref, o_ref)
    else:
        def kernel(y_ref, scale_ref, shift_ref, o_ref):
            compute(y_ref, scale_ref, shift_ref, None, o_ref)
    return kernel


def _conv_bn(patches, w_mat, gamma, beta, residual=None, relu=False,
             tile_m=None, out_dtype=jnp.float32, keep_padded=False):
    """conv-as-matmul (M,K)@(K,Cout) + training-mode BN [+ residual] [+ ReLU].

    `patches` / `residual` are expected in bf16.  BN batch statistics are reduced from the f32
    MXU accumulator inside pass 1 (never from the bf16-rounded y).  Returns (M, Cout) in
    `out_dtype`, or the full (M_pad, Cp) padded slab when keep_padded=True (so the caller can
    feed it straight back as a residual without another pad copy).
    """
    if tile_m is None:
        tile_m = _DEFAULT_TILE_M
    m, k = patches.shape
    cout = w_mat.shape[1]
    kp = _round_up(k, _LANE)        # lane-dense K
    cp = _round_up(cout, _LANE)     # lane-dense Cout (unmasked stores)
    tm, n_tiles, m_pad = _choose_tiles(m, tile_m)

    p = _pad2d(patches, m_pad, kp)
    if p.dtype != jnp.bfloat16:
        p = p.astype(jnp.bfloat16)
    w = _pad2d(w_mat, kp, cp).astype(jnp.bfloat16)

    # ---- pass 1: tiled matmul + stat partials (weight block stays resident) ----
    # TODO(synk): for Cin >= 512 (Kp ~4.6k) add a K grid axis ("arbitrary") with an f32 VMEM
    #             accumulator so the per-step slab stays bounded on v7x's 64 MiB VMEM.
    # TODO(synk): pipeline_mode=pl.Buffered(1) on the constant-index weight BlockSpec would
    #             reclaim one weight buffer of VMEM on v7x; left double-buffered for portability.
    y, stats = pl.pallas_call(
        _matmul_stats_kernel,
        out_shape=(jax.ShapeDtypeStruct((m_pad, cp), jnp.bfloat16),
                   jax.ShapeDtypeStruct((n_tiles, 2, cp), jnp.float32)),
        grid_spec=pltpu.PrefetchScalarGridSpec(
            num_scalar_prefetch=0,
            grid=(n_tiles,),
            in_specs=[pl.BlockSpec((tm, kp), lambda i: (i, 0)),
                      pl.BlockSpec((kp, cp), lambda i: (0, 0))],
            out_specs=[pl.BlockSpec((tm, cp), lambda i: (i, 0)),
                       pl.BlockSpec((1, 2, cp), lambda i: (i, 0, 0))]),
        compiler_params=_COMPILER_PARAMS,
    )(p, w)

    # ---- tiny cross-tile reduction -> batch mean / biased var -> folded scale/shift ----
    # TODO(synk): E[x^2]-E[x]^2 in f32 can cancel for large-mean/small-var activations; a second
    #             small pass computing sum((y-mean)^2) would track PyTorch BN even more tightly.
    col_sum = jnp.sum(stats[:, 0, :], axis=0)
    col_ssq = jnp.sum(stats[:, 1, :], axis=0)
    mean = col_sum / m                                   # divide by true M (padded rows are zero)
    var = jnp.maximum(col_ssq / m - mean * mean, 0.0)    # biased variance (PyTorch train fwd)
    g = jnp.pad(gamma.astype(jnp.float32), (0, cp - cout))
    b = jnp.pad(beta.astype(jnp.float32), (0, cp - cout))
    scale = g * jax.lax.rsqrt(var + _EPS)
    shift = b - mean * scale

    # ---- pass 2: tiled normalize (+ residual) (+ ReLU), bf16 streams ----
    args = [y, scale.reshape(1, cp), shift.reshape(1, cp)]
    in_specs = [pl.BlockSpec((tm, cp), lambda i: (i, 0)),
                pl.BlockSpec((1, cp), lambda i: (0, 0)),
                pl.BlockSpec((1, cp), lambda i: (0, 0))]
    if residual is not None:
        r = residual
        if r.shape != (m_pad, cp):        # skip the pad copy when already lane/row aligned
            r = _pad2d(r, m_pad, cp)
        if r.dtype != jnp.bfloat16:
            r = r.astype(jnp.bfloat16)
        args.append(r)
        in_specs.append(pl.BlockSpec((tm, cp), lambda i: (i, 0)))

    out = pl.pallas_call(
        _make_epilogue_kernel(apply_relu=relu, has_residual=residual is not None),
        out_shape=jax.ShapeDtypeStruct((m_pad, cp), out_dtype),
        grid_spec=pltpu.PrefetchScalarGridSpec(
            num_scalar_prefetch=0,
            grid=(n_tiles,),
            in_specs=in_specs,
            out_specs=pl.BlockSpec((tm, cp), lambda i: (i, 0))),
        compiler_params=_COMPILER_PARAMS,
    )(*args)

    if keep_padded:
        return out
    return out[:m, :cout]


# ----------------------------------------------------------------------------
# Plain-JAX glue: im2col (in bf16), layout plumbing, parameter reshaping
# ----------------------------------------------------------------------------
def _im2col(x_nhwc, k, stride, pad):
    n, h, w, c = x_nhwc.shape
    xp = jnp.pad(x_nhwc, ((0, 0), (pad, pad), (pad, pad), (0, 0)))
    ho = (h + 2 * pad - k) // stride + 1
    wo = (w + 2 * pad - k) // stride + 1
    cols = []
    for kh in range(k):
        for kw in range(k):
            cols.append(xp[:, kh:kh + stride * ho:stride, kw:kw + stride * wo:stride, :])
    p = jnp.stack(cols, axis=3)  # (N, Ho, Wo, k*k, C), taps ordered (kh, kw)
    return p.reshape(n * ho * wo, k * k * c), (ho, wo)


def _w_oihw_to_mat(w):
    """PyTorch OIHW conv weight -> (kh*kw*Cin, Cout) matching im2col (kh, kw, cin) ordering."""
    cout, cin, kh, kw = w.shape
    return jnp.transpose(w, (2, 3, 1, 0)).reshape(kh * kw * cin, cout)


def residual_block_forward(x_nchw, params, stride, tile_m=None):
    x = jnp.transpose(x_nchw, (0, 2, 3, 1))                      # NCHW -> NHWC
    n, h, w, cin = x.shape
    cout = params["w1"].shape[0]
    # Cast to bf16 BEFORE im2col so the 9x patch expansion is materialized in bf16 (half HBM).
    x_bf = x.astype(jnp.bfloat16)

    # conv1 (3x3, stride, pad=1) + bn1 + relu  -> bf16 (feeds conv2's im2col)
    p1, (ho, wo) = _im2col(x_bf, 3, stride, 1)
    y1 = _conv_bn(p1, _w_oihw_to_mat(params["w1"]), params["g1"], params["b1"],
                  relu=True, tile_m=tile_m, out_dtype=jnp.bfloat16)
    y1_img = y1.reshape(n, ho, wo, cout)

    # shortcut (bf16 residual stream; kept lane/row padded to skip a re-pad copy in pass 2)
    if stride != 1 or cin != cout:
        xs = x_bf[:, ::stride, ::stride, :].reshape(n * ho * wo, cin)   # 1x1-conv im2col
        sc = _conv_bn(xs, _w_oihw_to_mat(params["ws"]), params["gs"], params["bs"],
                      relu=False, tile_m=tile_m, out_dtype=jnp.bfloat16, keep_padded=True)
    else:
        sc = x_bf.reshape(n * h * w, cin)

    # conv2 (3x3, stride=1, pad=1) + bn2 + residual add + relu (fused in the pass-2 epilogue)
    # TODO(synk): next structural step is an in-kernel halo-slab direct 3x3 conv (9 shifted
    #             (tm,Cin)@(Cin,Cout) accumulations) to remove the 9x im2col HBM round trip.
    p2, _ = _im2col(y1_img, 3, 1, 1)
    y2 = _conv_bn(p2, _w_oihw_to_mat(params["w2"]), params["g2"], params["b2"],
                  residual=sc, relu=True, tile_m=tile_m, out_dtype=jnp.float32)

    return jnp.transpose(y2.reshape(n, ho, wo, cout), (0, 3, 1, 2))  # back to NCHW


# ----------------------------------------------------------------------------
# Pure-JAX f32 reference (for correctness check)
# ----------------------------------------------------------------------------
def _ref_forward(x, params, stride, eps=_EPS):
    def conv(x_, w_, s, pad):
        return jax.lax.conv_general_dilated(
            x_, w_, (s, s), ((pad, pad), (pad, pad)),
            dimension_numbers=("NCHW", "OIHW", "NCHW"))

    def bn(x_, g, b):
        mean = x_.mean(axis=(0, 2, 3), keepdims=True)
        var = ((x_ - mean) ** 2).mean(axis=(0, 2, 3), keepdims=True)
        return (x_ - mean) * jax.lax.rsqrt(var + eps) * g.reshape(1, -1, 1, 1) + b.reshape(1, -1, 1, 1)

    out = jax.nn.relu(bn(conv(x, params["w1"], stride, 1), params["g1"], params["b1"]))
    out = bn(conv(out, params["w2"], 1, 1), params["g2"], params["b2"])
    if stride != 1 or x.shape[1] != params["w1"].shape[0]:
        sc = bn(conv(x, params["ws"], stride, 0), params["gs"], params["bs"])
    else:
        sc = x
    return jax.nn.relu(out + sc)


# ----------------------------------------------------------------------------
# Deterministic parameter construction (shapes from ResidualBlock.__init__)
# ----------------------------------------------------------------------------
def make_params(key, in_channels, out_channels, stride):
    k1, k2, k3 = jax.random.split(key, 3)
    params = {
        "w1": 0.1 * jax.random.normal(k1, (out_channels, in_channels, 3, 3), jnp.float32),
        "g1": jnp.ones((out_channels,), jnp.float32),
        "b1": jnp.zeros((out_channels,), jnp.float32),
        "w2": 0.1 * jax.random.normal(k2, (out_channels, out_channels, 3, 3), jnp.float32),
        "g2": jnp.ones((out_channels,), jnp.float32),
        "b2": jnp.zeros((out_channels,), jnp.float32),
    }
    if stride != 1 or in_channels != out_channels:
        params["ws"] = 0.1 * jax.random.normal(k3, (out_channels, in_channels, 1, 1), jnp.float32)
        params["gs"] = jnp.ones((out_channels,), jnp.float32)
        params["bs"] = jnp.zeros((out_channels,), jnp.float32)
    return params


if __name__ == "__main__":
    key = jax.random.PRNGKey(0)
    kx, kp = jax.random.split(key)

    N, CIN, H, W = 2, 4, 16, 16
    COUT, STRIDE = 8, 2   # exercises the 1x1-conv + BN shortcut branch

    x = jax.random.normal(kx, (N, CIN, H, W), jnp.float32)
    params = make_params(kp, CIN, COUT, STRIDE)

    fwd = jax.jit(functools.partial(residual_block_forward, stride=STRIDE))
    out = jax.block_until_ready(fwd(x, params))

    ref = jax.block_until_ready(_ref_forward(x, params, STRIDE))
    assert out.shape == (N, COUT, H // STRIDE, W // STRIDE), out.shape
    # bf16 MXU operands AND bf16 HBM intermediates (y, patches, residual) -> compare to the f32
    # reference with a correspondingly looser max-error tolerance plus a tight mean-error check.
    max_err = float(jnp.max(jnp.abs(out - ref)))
    mean_err = float(jnp.mean(jnp.abs(out - ref)))
    assert max_err < 1e-1, (max_err, mean_err)
    assert mean_err < 2e-2, (max_err, mean_err)

    print("KERNEL_OK")
</pallas_src>

<mosaic_0001>
module attributes {stable_mosaic.version = 11 : i64} {
  func.func @_matmul_stats_kernel(%arg0: i32, %arg1: memref<64x128xbf16, #tpu.memory_space<vmem>>, %arg2: memref<128x128xbf16, #tpu.memory_space<vmem>>, %arg3: memref<64x128xbf16, #tpu.memory_space<vmem>>, %arg4: memref<1x2x128xf32, #tpu.memory_space<vmem>>) attributes {dimension_semantics = [#tpu.dimension_semantics<parallel>], iteration_bounds = array<i64: 2>, scalar_prefetch = 0 : i64, scratch_operands = 0 : i64, tpu.core_type = #tpu.core_type<tc>, window_params = [{transform_indices = @transform_0, window_bounds = array<i64: 64, 128>}, {pipeline_mode = #tpu.pipeline_mode<synchronous>, transform_indices = @transform_1, window_bounds = array<i64: 128, 128>}, {transform_indices = @transform_2, window_bounds = array<i64: 64, 128>}, {transform_indices = @transform_3, window_bounds = array<i64: 1, 2, 128>}]} {
    %c0 = arith.constant 0 : index
    %c0_0 = arith.constant 0 : index
    %0 = vector.load %arg1[%c0, %c0_0] : memref<64x128xbf16, #tpu.memory_space<vmem>>, vector<64x128xbf16>
    %c0_1 = arith.constant 0 : index
    %c0_2 = arith.constant 0 : index
    %1 = vector.load %arg2[%c0_1, %c0_2] : memref<128x128xbf16, #tpu.memory_space<vmem>>, vector<128x128xbf16>
    %cst = arith.constant dense<0.000000e+00> : vector<64x128xf32>
    %2 = tpu.matmul %0, %1, %cst {dimension_numbers = #tpu.dot_dimension_numbers<[1], [0], [0], [1], [0, 0, 1, 1], [], []>} : vector<64x128xbf16>, vector<128x128xbf16>, vector<64x128xf32> -> vector<64x128xf32>
    %3 = arith.truncf %2 : vector<64x128xf32> to vector<64x128xbf16>
    %c0_3 = arith.constant 0 : index
    %c0_4 = arith.constant 0 : index
    %4 = vector.load %arg3[%c0_3, %c0_4] : memref<64x128xbf16, #tpu.memory_space<vmem>>, vector<64x128xbf16>
    tpu.vector_store %arg3[%c0_3, %c0_4], %3 {strides = array<i32>} : memref<64x128xbf16, #tpu.memory_space<vmem>>, vector<64x128xbf16>,
    %cst_5 = arith.constant dense<0.000000e+00> : vector<128xf32>
    %5 = vector.multi_reduction <add>, %2, %cst_5 [0] : vector<64x128xf32> to vector<128xf32>
    %6 = arith.mulf %2, %2 : vector<64x128xf32>
    %cst_6 = arith.constant dense<0.000000e+00> : vector<128xf32>
    %7 = vector.multi_reduction <add>, %6, %cst_6 [0] : vector<64x128xf32> to vector<128xf32>
    %8 = vector.shape_cast %5 : vector<128xf32> to vector<1x128xf32>
    %9 = vector.shape_cast %7 : vector<128xf32> to vector<1x128xf32>
    %10 = tpu.concatenate %8, %9 in 0 : vector<1x128xf32>, vector<1x128xf32> -> vector<2x128xf32>
    %11 = vector.shape_cast %10 : vector<2x128xf32> to vector<1x2x128xf32>
    %c0_7 = arith.constant 0 : index
    %c0_8 = arith.constant 0 : index
    %c0_9 = arith.constant 0 : index
    %12 = vector.load %arg4[%c0_7, %c0_8, %c0_9] : memref<1x2x128xf32, #tpu.memory_space<vmem>>, vector<1x2x128xf32>
    tpu.vector_store %arg4[%c0_7, %c0_8, %c0_9], %11 {strides = array<i32>} : memref<1x2x128xf32, #tpu.memory_space<vmem>>, vector<1x2x128xf32>,
    return
  }
  func.func @transform_0(%arg0: i32) -> (i32, i32) {
    %c0_i32 = arith.constant 0 : i32
    %c0_i32_0 = arith.constant 0 : i32
    return %arg0, %c0_i32 : i32, i32
  }
  func.func @transform_1(%arg0: i32) -> (i32, i32) {
    %c0_i32 = arith.constant 0 : i32
    %c0_i32_0 = arith.constant 0 : i32
    %c0_i32_1 = arith.constant 0 : i32
    return %c0_i32, %c0_i32_0 : i32, i32
  }
  func.func @transform_2(%arg0: i32) -> (i32, i32) {
    %c0_i32 = arith.constant 0 : i32
    %c0_i32_0 = arith.constant 0 : i32
    return %arg0, %c0_i32 : i32, i32
  }
  func.func @transform_3(%arg0: i32) -> (i32, i32, i32) {
    %c0_i32 = arith.constant 0 : i32
    %c0_i32_0 = arith.constant 0 : i32
    %c0_i32_1 = arith.constant 0 : i32
    return %arg0, %c0_i32, %c0_i32_0 : i32, i32, i32
  }
}

module attributes {stable_mosaic.version = 11 : i64} {
  func.func @kernel(%arg0: i32, %arg1: memref<64x128xbf16, #tpu.memory_space<vmem>>, %arg2: memref<1x128xf32, #tpu.memory_space<vmem>>, %arg3: memref<1x128xf32, #tpu.memory_space<vmem>>, %arg4: memref<64x128xbf16, #tpu.memory_space<vmem>>) attributes {dimension_semantics = [#tpu.dimension_semantics<parallel>], iteration_bounds = array<i64: 2>, scalar_prefetch = 0 : i64, scratch_operands = 0 : i64, tpu.core_type = #tpu.core_type<tc>, window_params = [{transform_indices = @transform_0, window_bounds = array<i64: 64, 128>}, {pipeline_mode = #tpu.pipeline_mode<synchronous>, transform_indices = @transform_1, window_bounds = array<i64: 1, 128>}, {pipeline_mode = #tpu.pipeline_mode<synchronous>, transform_indices = @transform_2, window_bounds = array<i64: 1, 128>}, {transform_indices = @transform_3, window_bounds = array<i64: 64, 128>}]} {
    %c0 = arith.constant 0 : index
    %c0_0 = arith.constant 0 : index
    %0 = vector.load %arg1[%c0, %c0_0] : memref<64x128xbf16, #tpu.memory_space<vmem>>, vector<64x128xbf16>
    %1 = arith.extf %0 : vector<64x128xbf16> to vector<64x128xf32>
    %c0_1 = arith.constant 0 : index
    %c0_2 = arith.constant 0 : index
    %2 = vector.load %arg2[%c0_1, %c0_2] : memref<1x128xf32, #tpu.memory_space<vmem>>, vector<1x128xf32>
    %3 = vector.broadcast %2 : vector<1x128xf32> to vector<64x128xf32>
    %4 = arith.mulf %1, %3 : vector<64x128xf32>
    %c0_3 = arith.constant 0 : index
    %c0_4 = arith.constant 0 : index
    %5 = vector.load %arg3[%c0_3, %c0_4] : memref<1x128xf32, #tpu.memory_space<vmem>>, vector<1x128xf32>
    %6 = vector.broadcast %5 : vector<1x128xf32> to vector<64x128xf32>
    %7 = arith.addf %4, %6 : vector<64x128xf32>
    %cst = arith.constant 0.000000e+00 : f32
    %8 = vector.broadcast %cst : f32 to vector<64x128xf32>
    %9 = arith.maximumf %7, %8 : vector<64x128xf32>
    %10 = arith.truncf %9 : vector<64x128xf32> to vector<64x128xbf16>
    %c0_5 = arith.constant 0 : index
    %c0_6 = arith.constant 0 : index
    %11 = vector.load %arg4[%c0_5, %c0_6] : memref<64x128xbf16, #tpu.memory_space<vmem>>, vector<64x128xbf16>
    tpu.vector_store %arg4[%c0_5, %c0_6], %10 {strides = array<i32>} : memref<64x128xbf16, #tpu.memory_space<vmem>>, vector<64x128xbf16>,
    return
  }
  func.func @transform_0(%arg0: i32) -> (i32, i32) {
    %c0_i32 = arith.constant 0 : i32
    %c0_i32_0 = arith.constant 0 : i32
    return %arg0, %c0_i32 : i32, i32
  }
  func.func @transform_1(%arg0: i32) -> (i32, i32) {
    %c0_i32 = arith.constant 0 : i32
    %c0_i32_0 = arith.constant 0 : i32
    %c0_i32_1 = arith.constant 0 : i32
    return %c0_i32, %c0_i32_0 : i32, i32
  }
  func.func @transform_2(%arg0: i32) -> (i32, i32) {
    %c0_i32 = arith.constant 0 : i32
    %c0_i32_0 = arith.constant 0 : i32
    %c0_i32_1 = arith.constant 0 : i32
    return %c0_i32, %c0_i32_0 : i32, i32
  }
  func.func @transform_3(%arg0: i32) -> (i32, i32) {
    %c0_i32 = arith.constant 0 : i32
    %c0_i32_0 = arith.constant 0 : i32
    return %arg0, %c0_i32 : i32, i32
  }
}

module attributes {stable_mosaic.version = 11 : i64} {
  func.func @kernel(%arg0: i32, %arg1: memref<64x128xbf16, #tpu.memory_space<vmem>>, %arg2: memref<1x128xf32, #tpu.memory_space<vmem>>, %arg3: memref<1x128xf32, #tpu.memory_space<vmem>>, %arg4: memref<64x128xbf16, #tpu.memory_space<vmem>>) attributes {dimension_semantics = [#tpu.dimension_semantics<parallel>], iteration_bounds = array<i64: 2>, scalar_prefetch = 0 : i64, scratch_operands = 0 : i64, tpu.core_type = #tpu.core_type<tc>, window_params = [{transform_indices = @transform_0, window_bounds = array<i64: 64, 128>}, {pipeline_mode = #tpu.pipeline_mode<synchronous>, transform_indices = @transform_1, window_bounds = array<i64: 1, 128>}, {pipeline_mode = #tpu.pipeline_mode<synchronous>, transform_indices = @transform_2, window_bounds = array<i64: 1, 128>}, {transform_indices = @transform_3, window_bounds = array<i64: 64, 128>}]} {
    %c0 = arith.constant 0 : index
    %c0_0 = arith.constant 0 : index
    %0 = vector.load %arg1[%c0, %c0_0] : memref<64x128xbf16, #tpu.memory_space<vmem>>, vector<64x128xbf16>
    %1 = arith.extf %0 : vector<64x128xbf16> to vector<64x128xf32>
    %c0_1 = arith.constant 0 : index
    %c0_2 = arith.constant 0 : index
    %2 = vector.load %arg2[%c0_1, %c0_2] : memref<1x128xf32, #tpu.memory_space<vmem>>, vector<1x128xf32>
    %3 = vector.broadcast %2 : vector<1x128xf32> to vector<64x128xf32>
    %4 = arith.mulf %1, %3 : vector<64x128xf32>
    %c0_3 = arith.constant 0 : index
    %c0_4 = arith.constant 0 : index
    %5 = vector.load %arg3[%c0_3, %c0_4] : memref<1x128xf32, #tpu.memory_space<vmem>>, vector<1x128xf32>
    %6 = vector.broadcast %5 : vector<1x128xf32> to vector<64x128xf32>
    %7 = arith.addf %4, %6 : vector<64x128xf32>
    %8 = arith.truncf %7 : vector<64x128xf32> to vector<64x128xbf16>
    %c0_5 = arith.constant 0 : index
    %c0_6 = arith.constant 0 : index
    %9 = vector.load %arg4[%c0_5, %c0_6] : memref<64x128xbf16, #tpu.memory_space<vmem>>, vector<64x128xbf16>
    tpu.vector_store %arg4[%c0_5, %c0_6], %8 {strides = array<i32>} : memref<64x128xbf16, #tpu.memory_space<vmem>>, vector<64x128xbf16>,
    return
  }
  func.func @transform_0(%arg0: i32) -> (i32, i32) {
    %c0_i32 = arith.constant 0 : i32
    %c0_i32_0 = arith.constant 0 : i32
    return %arg0, %c0_i32 : i32, i32
  }
  func.func @transform_1(%arg0: i32) -> (i32, i32) {
    %c0_i32 = arith.constant 0 : i32
    %c0_i32_0 = arith.constant 0 : i32
    %c0_i32_1 = arith.constant 0 : i32
    return %c0_i32, %c0_i32_0 : i32, i32
  }
  func.func @transform_2(%arg0: i32) -> (i32, i32) {
    %c0_i32 = arith.constant 0 : i32
    %c0_i32_0 = arith.constant 0 : i32
    %c0_i32_1 = arith.constant 0 : i32
    return %c0_i32, %c0_i32_0 : i32, i32
  }
  func.func @transform_3(%arg0: i32) -> (i32, i32) {
    %c0_i32 = arith.constant 0 : i32
    %c0_i32_0 = arith.constant 0 : i32
    return %arg0, %c0_i32 : i32, i32
  }
}

module attributes {stable_mosaic.version = 11 : i64} {
  func.func @kernel(%arg0: i32, %arg1: memref<64x128xbf16, #tpu.memory_space<vmem>>, %arg2: memref<1x128xf32, #tpu.memory_space<vmem>>, %arg3: memref<1x128xf32, #tpu.memory_space<vmem>>, %arg4: memref<64x128xbf16, #tpu.memory_space<vmem>>, %arg5: memref<64x128xf32, #tpu.memory_space<vmem>>) attributes {dimension_semantics = [#tpu.dimension_semantics<parallel>], iteration_bounds = array<i64: 2>, scalar_prefetch = 0 : i64, scratch_operands = 0 : i64, tpu.core_type = #tpu.core_type<tc>, window_params = [{transform_indices = @transform_0, window_bounds = array<i64: 64, 128>}, {pipeline_mode = #tpu.pipeline_mode<synchronous>, transform_indices = @transform_1, window_bounds = array<i64: 1, 128>}, {pipeline_mode = #tpu.pipeline_mode<synchronous>, transform_indices = @transform_2, window_bounds = array<i64: 1, 128>}, {transform_indices = @transform_3, window_bounds = array<i64: 64, 128>}, {transform_indices = @transform_4, window_bounds = array<i64: 64, 128>}]} {
    %c0 = arith.constant 0 : index
    %c0_0 = arith.constant 0 : index
    %0 = vector.load %arg1[%c0, %c0_0] : memref<64x128xbf16, #tpu.memory_space<vmem>>, vector<64x128xbf16>
    %1 = arith.extf %0 : vector<64x128xbf16> to vector<64x128xf32>
    %c0_1 = arith.constant 0 : index
    %c0_2 = arith.constant 0 : index
    %2 = vector.load %arg2[%c0_1, %c0_2] : memref<1x128xf32, #tpu.memory_space<vmem>>, vector<1x128xf32>
    %3 = vector.broadcast %2 : vector<1x128xf32> to vector<64x128xf32>
    %4 = arith.mulf %1, %3 : vector<64x128xf32>
    %c0_3 = arith.constant 0 : index
    %c0_4 = arith.constant 0 : index
    %5 = vector.load %arg3[%c0_3, %c0_4] : memref<1x128xf32, #tpu.memory_space<vmem>>, vector<1x128xf32>
    %6 = vector.broadcast %5 : vector<1x128xf32> to vector<64x128xf32>
    %7 = arith.addf %4, %6 : vector<64x128xf32>
    %c0_5 = arith.constant 0 : index
    %c0_6 = arith.constant 0 : index
    %8 = vector.load %arg4[%c0_5, %c0_6] : memref<64x128xbf16, #tpu.memory_space<vmem>>, vector<64x128xbf16>
    %9 = arith.extf %8 : vector<64x128xbf16> to vector<64x128xf32>
    %10 = arith.addf %7, %9 : vector<64x128xf32>
    %cst = arith.constant 0.000000e+00 : f32
    %11 = vector.broadcast %cst : f32 to vector<64x128xf32>
    %12 = arith.maximumf %10, %11 : vector<64x128xf32>
    %c0_7 = arith.constant 0 : index
    %c0_8 = arith.constant 0 : index
    %13 = vector.load %arg5[%c0_7, %c0_8] : memref<64x128xf32, #tpu.memory_space<vmem>>, vector<64x128xf32>
    tpu.vector_store %arg5[%c0_7, %c0_8], %12 {strides = array<i32>} : memref<64x128xf32, #tpu.memory_space<vmem>>, vector<64x128xf32>,
    return
  }
  func.func @transform_0(%arg0: i32) -> (i32, i32) {
    %c0_i32 = arith.constant 0 : i32
    %c0_i32_0 = arith.constant 0 : i32
    return %arg0, %c0_i32 : i32, i32
  }
  func.func @transform_1(%arg0: i32) -> (i32, i32) {
    %c0_i32 = arith.constant 0 : i32
    %c0_i32_0 = arith.constant 0 : i32
    %c0_i32_1 = arith.constant 0 : i32
    return %c0_i32, %c0_i32_0 : i32, i32
  }
  func.func @transform_2(%arg0: i32) -> (i32, i32) {
    %c0_i32 = arith.constant 0 : i32
    %c0_i32_0 = arith.constant 0 : i32
    %c0_i32_1 = arith.constant 0 : i32
    return %c0_i32, %c0_i32_0 : i32, i32
  }
  func.func @transform_3(%arg0: i32) -> (i32, i32) {
    %c0_i32 = arith.constant 0 : i32
    %c0_i32_0 = arith.constant 0 : i32
    return %arg0, %c0_i32 : i32, i32
  }
  func.func @transform_4(%arg0: i32) -> (i32, i32) {
    %c0_i32 = arith.constant 0 : i32
    %c0_i32_0 = arith.constant 0 : i32
    return %arg0, %c0_i32 : i32, i32
  }
}

</mosaic_0001>

<bundles_post_ra>
// kernel: residual_block_forward.7
= control target key start
LH: loop header
LB: loop body
LE: loop exit
PB: predicated region body
PF: predicated region fallthrough
CT: control target
= control target key end

     0   :  { %s431_s12 = smov 0   ;;  %s461_s0 = inlined_call_operand.vmem [shape: bf16[128,128], index: 0, kind: input, shape index: {}]   ;;  %s462_s1 = inlined_call_operand.vmem [shape: f32[1,128], index: 1, kind: input, shape index: {}]   ;;  %s463_s2 = inlined_call_operand.vmem [shape: f32[1,128], index: 2, kind: input, shape index: {}]   ;;  %s464_s3 = inlined_call_operand.vmem [shape: bf16[128,128], index: 3, kind: output, shape index: {}]  }
   0x1 LB: > { %s324_s13 = sadd.s32 4294967295, %s409_s12   ;;  %p328_p0 = scmp.ge.s32.totalorder %s409_s12, 1  ;;  %s409_s12 = sphi %s431_s12, %s13_s12  }
   0x2   : > { %p138_p1 = scmp.lt.s32.totalorder %s409_s12, 3 }
   0x4   : > { %p139_p2 = pnand %p328_p0, %p138_p1 }
   0x5   : > { %s329_s14 = sshll.u32 (!%p139_p2), %s324_s13, 3  ;;  %v333_v0 = vld [vmem:[%s462_s1] ss:$0 sm:$0xff] (!%p139_p2) }
   0x6   : > { %142 = sbr.rel (%p139_p2) target bundleno = 29 (0x1d), region = 32  ;;  %p163_p3 = scmp.lt.s32.totalorder (!%p139_p2), %s329_s14, 15  ;;  %v334_v9 = vld [vmem:[%s463_s2] ss:$0 sm:$0xff] (!%p139_p2) }
   0xd   : > { %s466_s14 = smov (!%p163_p3, %s329_s14), 15 }
   0xe   : > { %s330_s15 = sshll.u32 %s466_s14, 2 }
   0xf   : > { %s166_s18 = scalar_lea.vmem %s461_s0, %s330_s15  ;;  %s172_s25 = scalar_lea.vmem %s464_s3, %s330_s15 }
  0x10   : > { %v354_v1 = vld [vmem:[%s166_s18] sm:$0xff]   ;;  %v389_v2 = vld [vmem:[%s166_s18 + $0x8] sm:$0xff]   ;;  %v390_v3 = vld [vmem:[%s166_s18 + $0x10] sm:$0xff]  }
  0x11   : > { %v355_v4 = vunpack.c.l.bf16 %v354_v1  ;;  %v356_v5 = vunpack.c.h.bf16 %v354_v1  ;;  %v359_v6 = vunpack.c.l.bf16 %v389_v2  ;;  %v360_v7 = vunpack.c.h.bf16 %v389_v2  ;;  %v391_v8 = vld [vmem:[%s166_s18 + $0x18] sm:$0xff]  }
  0x12   : > { %v363_v10 = vunpack.c.l.bf16 %v390_v3  ;;  %v364_v11 = vunpack.c.h.bf16 %v390_v3  ;;  %v367_v12 = vunpack.c.l.bf16 %v391_v8  ;;  %v368_v13 = vunpack.c.h.bf16 %v391_v8 }
  0x13   : > { %v197_v14 = vmul.f32 %v355_v4, %v333_v0  ;;  %v198_v15 = vmul.f32 %v356_v5, %v333_v0  ;;  %v199_v16 = vmul.f32 %v359_v6, %v333_v0  ;;  %v200_v17 = vmul.f32 %v360_v7, %v333_v0 }
  0x14   : > { %v201_v18 = vmul.f32 %v363_v10, %v333_v0  ;;  %v202_v19 = vmul.f32 %v364_v11, %v333_v0  ;;  %v203_v20 = vmul.f32 %v367_v12, %v333_v0  ;;  %v204_v21 = vmul.f32 %v368_v13, %v333_v0 }
  0x15   : > { %v212_v22 = vadd.f32 %v334_v9, %v197_v14  ;;  %v213_v23 = vadd.f32 %v334_v9, %v198_v15  ;;  %v214_v24 = vadd.f32 %v334_v9, %v199_v16  ;;  %v215_v25 = vadd.f32 %v334_v9, %v200_v17 }
  0x16   : > { %v216_v26 = vadd.f32 %v334_v9, %v201_v18  ;;  %v217_v27 = vadd.f32 %v334_v9, %v202_v19  ;;  %v218_v28 = vadd.f32 %v334_v9, %v203_v20  ;;  %v219_v29 = vadd.f32 %v334_v9, %v204_v21 }
  0x17   : > { %v220_v30 = vmax.f32 %v212_v22, 0.0  ;;  %v221_v31 = vmax.f32 %v213_v23, 0.0  ;;  %v222_v32 = vmax.f32 %v214_v24, 0.0  ;;  %v223_v33 = vmax.f32 %v215_v25, 0.0 }
  0x18   : > { %v224_v34 = vmax.f32 %v216_v26, 0.0  ;;  %v225_v35 = vmax.f32 %v217_v27, 0.0  ;;  %v226_v36 = vmax.f32 %v218_v28, 0.0  ;;  %v227_v37 = vmax.f32 %v219_v29, 0.0 }
  0x19   : > { %v372_v38 = vpack.c.bf16 %v221_v31, %v220_v30  ;;  %v377_v39 = vpack.c.bf16 %v223_v33, %v222_v32 }
  0x1a   : > { %v382_v40 = vpack.c.bf16 %v225_v35, %v224_v34  ;;  %v387_v41 = vpack.c.bf16 %v227_v37, %v226_v36 }
  0x1b   : > { %373 = vst [vmem:[%s172_s25] sm:$0xff] %v372_v38   ;;  %392 = vst [vmem:[%s172_s25 + $0x8] sm:$0xff] %v377_v39  }
  0x1c   : > { %393 = vst [vmem:[%s172_s25 + $0x10] sm:$0xff] %v382_v40   ;;  %394 = vst [vmem:[%s172_s25 + $0x18] sm:$0xff] %v387_v41  }
  0x1d PF: > { %s13_s12 = sadd.s32 1, %s409_s12  }
  0x1e   : > { %p10_p4 = scmp.ge.s32.totalorder %s13_s12, 4  }
  0x20   :  { %12 = sbr.rel (!%p10_p4) target bundleno = 1 (0x1), region = 62 }

// kernel: residual_block_forward.6
= control target key start
LH: loop header
LB: loop body
LE: loop exit
PB: predicated region body
PF: predicated region fallthrough
CT: control target
= control target key end

     0   :  { %s674_s12 = smov 0   ;;  %s736_s0 = inlined_call_operand.vmem [shape: bf16[128,128], index: 0, kind: input, shape index: {}]   ;;  %s737_s1 = inlined_call_operand.vmem [shape: bf16[128,128], index: 1, kind: input, shape index: {}]   ;;  %s738_s2 = inlined_call_operand.vmem [shape: bf16[128,128], index: 2, kind: output, shape index: {0}]   ;;  %s739_s3 = inlined_call_operand.vmem [shape: f32[2,2,128], index: 3, kind: output, shape index: {1}]  }
   0x1 LB: > { %s680_s13 = sadd.s32 4294967295, %s652_s12   ;;  %p515_p0 = scmp.ge.s32.totalorder %s652_s12, 1  ;;  %s652_s12 = sphi %s674_s12, %s14_s12  }
   0x2   : > { %p141_p1 = scmp.lt.s32.totalorder %s652_s12, 3 }
   0x4   : > { %p142_p2 = pnand %p515_p0, %p141_p1 }
   0x5   : > { %v634_v0 = vld [vmem:[%s737_s1] sm:$0xff] (!%p142_p2)   ;;  %s516_s16 = sshll.u32 (!%p142_p2), %s680_s13, 3  ;;  %v635_v1 = vld [vmem:[%s737_s1 + $0x8] sm:$0xff] (!%p142_p2)   ;;  %v636_v2 = vld [vmem:[%s737_s1 + $0x10] sm:$0xff] (!%p142_p2)   ;;  %p181_p4 = scmp.lt.s32.totalorder (!%p142_p2), %s680_s13, 1  ;;  %vm421_vm0 = vcmask (!%p142_p2), 1040384  }
   0x6   : > { %145 = sbr.rel (%p142_p2) target bundleno = 283 (0x11b), region = 28  ;;  %p170_p3 = scmp.lt.s32.totalorder (!%p142_p2), %s516_s16, 15  ;;  %586 = vmatprep.subr.bf16.mxu0 (!%p142_p2), %v634_v0  ;;  %610 = vmatprep.subr.bf16.mxu1 (!%p142_p2), %v634_v0  ;;  %v637_v3 = vld [vmem:[%s737_s1 + $0x18] sm:$0xff] (!%p142_p2)   ;;  %v638_v6 = vld [vmem:[%s737_s1 + $0x20] sm:$0xff] (!%p142_p2)   ;;  %v639_v7 = vld [vmem:[%s737_s1 + $0x28] sm:$0xff] (!%p142_p2)  }
   0x7   : > { %587 = vmatpush3.bf16.msra.mxu0 (!%p142_p2), %v634_v0  ;;  %618 = vmatpush3.bf16.msra.mxu1 (!%p142_p2), %v634_v0  ;;  %v640_v8 = vld [vmem:[%s737_s1 + $0x30] sm:$0xff] (!%p142_p2)   ;;  %v641_v9 = vld [vmem:[%s737_s1 + $0x38] sm:$0xff] (!%p142_p2)  }
   0x8   : > { %588 = vmatprep.subr.bf16.mxu0 (!%p142_p2), %v635_v1  ;;  %611 = vmatprep.subr.bf16.mxu1 (!%p142_p2), %v635_v1 }
   0xb   : > { %589 = vmatpush3.bf16.msra.mxu0 (!%p142_p2), %v635_v1  ;;  %619 = vmatpush3.bf16.msra.mxu1 (!%p142_p2), %v635_v1 }
   0xc   : > { %590 = vmatprep.subr.bf16.mxu0 (!%p142_p2), %v636_v2  ;;  %612 = vmatprep.subr.bf16.mxu1 (!%p142_p2), %v636_v2 }
   0xd   : > { %s741_s16 = smov (!%p170_p3, %s516_s16), 15  ;;  %s743_s13 = smov (!%p181_p4, %s680_s13), 1 }
   0xe   : > { %s517_s21 = sshll.u32 %s741_s16, 2  ;;  %s520_s11 = sshll.u32 %s743_s13, 1 }
   0xf   : > { %s702_s24 = scalar_lea.vmem %s736_s0, %s517_s21  ;;  %591 = vmatpush3.bf16.msra.mxu0 %v636_v2  ;;  %620 = vmatpush3.bf16.msra.mxu1 %v636_v2  ;;  %s179_s10 = scalar_lea.vmem %s738_s2, %s517_s21 }
  0x10   : > { %v642_v4 = vld [vmem:[%s702_s24] sm:$0xff]   ;;  %v644_v5 = vld [vmem:[%s702_s24 + $0x10] sm:$0xff]   ;;  %592 = vmatprep.subr.bf16.mxu0 %v637_v3  ;;  %613 = vmatprep.subr.bf16.mxu1 %v637_v3  ;;  %v643_v10 = vld [vmem:[%s702_s24 + $0x8] sm:$0xff]   ;;  %s184_s16 = scalar_lea.vmem %s739_s3, %s520_s11 }
  0x11   : > { %602 = vmatprep.mubr.bf16.mxu0 %v642_v4  ;;  %606 = vmatprep.mubr.bf16.mxu1 %v644_v5  ;;  %v645_v11 = vld [vmem:[%s702_s24 + $0x18] sm:$0xff]  }
  0x13   : > { %593 = vmatpush3.bf16.msra.mxu0 %v637_v3  ;;  %621 = vmatpush3.bf16.msra.mxu1 %v637_v3 }
  0x14   : > { %594 = vmatprep.subr.bf16.mxu0 %v638_v6  ;;  %614 = vmatprep.subr.bf16.mxu1 %v638_v6 }
  0x17   : > { %595 = vmatpush3.bf16.msra.mxu0 %v638_v6  ;;  %622 = vmatpush3.bf16.msra.mxu1 %v638_v6 }
  0x18   : > { %596 = vmatprep.subr.bf16.mxu0 %v639_v7  ;;  %615 = vmatprep.subr.bf16.mxu1 %v639_v7 }
  0x1b   : > { %597 = vmatpush3.bf16.msra.mxu0 %v639_v7  ;;  %623 = vmatpush3.bf16.msra.mxu1 %v639_v7 }
  0x1c   : > { %598 = vmatprep.subr.bf16.mxu0 %v640_v8  ;;  %616 = vmatprep.subr.bf16.mxu1 %v640_v8 }
  0x1f   : > { %599 = vmatpush3.bf16.msra.mxu0 %v640_v8  ;;  %624 = vmatpush3.bf16.msra.mxu1 %v640_v8 }
  0x20   : > { %600 = vmatprep.subr.bf16.mxu0 %v641_v9  ;;  %617 = vmatprep.subr.bf16.mxu1 %v641_v9 }
  0x23   : > { %601 = vmatpush3.bf16.msra.mxu0 %v641_v9  ;;  %625 = vmatpush3.bf16.msra.mxu1 %v641_v9 }
  0x26   : > { %603 = vmatmul.mubr.bf16.vlgmr.msra.gmra.mrb[0].mxu0 %v643_v10  ;;  %607 = vmatmul.mubr.bf16.vlgmr.msra.gmra.mrb[0].mxu1 %v645_v11 }
  0xf9   : > { %v604_v12 = vpop.f32.mrb[0].mxu0  ;;  %v608_v13 = vpop.f32.mrb[0].mxu1 }
  0xfa   : > { %v316_v14 = vpop.f32.mrb[1].mxu0  ;;  %v332_v15 = vpop.f32.mrb[1].mxu1  ;;  %v402_v27 = vmul.f32 %v604_v12, %v604_v12  ;;  %v406_v39 = vmul.f32 %v608_v13, %v608_v13 }
  0xfb   : > { %v605_v16 = vpop.f32.mrb[2].mxu0  ;;  %v609_v17 = vpop.f32.mrb[2].mxu1  ;;  %v400_v18 = vmul.f32 %v316_v14, %v316_v14  ;;  %v404_v33 = vmul.f32 %v332_v15, %v332_v15 }
  0xfc   : > { %v559_v19 = vpack.c.bf16 %v605_v16, %v604_v12  ;;  %v319_v20 = vpop.f32.mrb[3].mxu0  ;;  %v569_v21 = vpack.c.bf16 %v609_v17, %v608_v13  ;;  %v335_v22 = vpop.f32.mrb[3].mxu1  ;;  %v403_v30 = vmul.f32 %v605_v16, %v605_v16  ;;  %v407_v42 = vmul.f32 %v609_v17, %v609_v17 }
  0xfd   : > { %v554_v23 = vpack.c.bf16 %v319_v20, %v316_v14  ;;  %v387_v24 = vadd.f32 %v319_v20, %v316_v14  ;;  %v401_v25 = vmul.f32 %v319_v20, %v319_v20  ;;  %v564_v26 = vpack.c.bf16 %v335_v22, %v332_v15 }
  0xfe   : > { %571 = vst [vmem:[%s179_s10 + $0x8] sm:$0xff] %v559_v19   ;;  %573 = vst [vmem:[%s179_s10 + $0x18] sm:$0xff] %v569_v21   ;;  %v405_v38 = vmul.f32 %v335_v22, %v335_v22 }
  0xff   : > { %555 = vst [vmem:[%s179_s10] sm:$0xff] %v554_v23   ;;  %v388_v28 = vadd.f32 %v604_v12, %v387_v24  ;;  %v408_v29 = vadd.f32 %v401_v25, %v400_v18  ;;  %572 = vst [vmem:[%s179_s10 + $0x10] sm:$0xff] %v564_v26  }
 0x101   : > { %v409_v31 = vadd.f32 %v408_v29, %v402_v27  ;;  %v389_v32 = vadd.f32 %v605_v16, %v388_v28 }
 0x103   : > { %v390_v34 = vadd.f32 %v389_v32, %v332_v15  ;;  %v410_v35 = vadd.f32 %v409_v31, %v403_v30 }
 0x105   : > { %v411_v36 = vadd.f32 %v410_v35, %v404_v33  ;;  %v391_v37 = vadd.f32 %v390_v34, %v335_v22 }
 0x107   : > { %v392_v40 = vadd.f32 %v608_v13, %v391_v37  ;;  %v412_v41 = vadd.f32 %v411_v36, %v405_v38 }
 0x109   : > { %v393_v43 = vadd.f32 %v609_v17, %v392_v40  ;;  %v413_v44 = vadd.f32 %v412_v41, %v406_v39 }
 0x10b   : > { %v394_v45 = vrot.slane %v393_v43, 4  ;;  %v414_v46 = vadd.f32 %v413_v44, %v407_v42 }
 0x10d   : > { %v395_v47 = vadd.f32 %v394_v45, %v393_v43  ;;  %v415_v48 = vrot.slane %v414_v46, 4 }
 0x10f   : > { %v396_v49 = vrot.slane %v395_v47, 2  ;;  %v416_v50 = vadd.f32 %v415_v48, %v414_v46 }
 0x111   : > { %v397_v51 = vadd.f32 %v396_v49, %v395_v47  ;;  %v417_v52 = vrot.slane %v416_v50, 2 }
 0x113   : > { %v398_v53 = vrot.slane %v397_v51, 1  ;;  %v418_v54 = vadd.f32 %v417_v52, %v416_v50 }
 0x115   : > { %v419_v55 = vrot.slane %v418_v54, 1  ;;  %v399_v56 = vadd.f32 %v398_v53, %v397_v51 }
 0x117   : > { %v420_v57 = vadd.f32 %v419_v55, %v418_v54 }
 0x119   : > { %v422_v58 = vsel %vm421_vm0, %v399_v56, %v420_v57 }
 0x11a   : > { %423 = vst [vmem:[%s184_s16] sm:$0x3] %v422_v58 }
 0x11b PF: > { %s14_s12 = sadd.s32 1, %s652_s12  }
 0x11c   : > { %p11_p5 = scmp.ge.s32.totalorder %s14_s12, 4  }
 0x11e   :  { %13 = sbr.rel (!%p11_p5) target bundleno = 1 (0x1), region = 70 }

// kernel: residual_block_forward.9
= control target key start
LH: loop header
LB: loop body
LE: loop exit
PB: predicated region body
PF: predicated region fallthrough
CT: control target
= control target key end

     0   :  { %s423_s12 = smov 0   ;;  %s449_s0 = inlined_call_operand.vmem [shape: bf16[128,128], index: 0, kind: input, shape index: {}]   ;;  %s450_s1 = inlined_call_operand.vmem [shape: f32[1,128], index: 1, kind: input, shape index: {}]   ;;  %s451_s2 = inlined_call_operand.vmem [shape: f32[1,128], index: 2, kind: input, shape index: {}]   ;;  %s452_s3 = inlined_call_operand.vmem [shape: bf16[128,128], index: 3, kind: output, shape index: {}]  }
   0x1 LB: > { %s316_s13 = sadd.s32 4294967295, %s401_s12   ;;  %p320_p0 = scmp.ge.s32.totalorder %s401_s12, 1  ;;  %s401_s12 = sphi %s423_s12, %s13_s12  }
   0x2   : > { %p138_p1 = scmp.lt.s32.totalorder %s401_s12, 3 }
   0x4   : > { %p139_p2 = pnand %p320_p0, %p138_p1 }
   0x5   : > { %s321_s14 = sshll.u32 (!%p139_p2), %s316_s13, 3  ;;  %v325_v0 = vld [vmem:[%s450_s1] ss:$0 sm:$0xff] (!%p139_p2) }
   0x6   : > { %142 = sbr.rel (%p139_p2) target bundleno = 27 (0x1b), region = 32  ;;  %p163_p3 = scmp.lt.s32.totalorder (!%p139_p2), %s321_s14, 15  ;;  %v326_v9 = vld [vmem:[%s451_s2] ss:$0 sm:$0xff] (!%p139_p2) }
   0xd   : > { %s454_s14 = smov (!%p163_p3, %s321_s14), 15 }
   0xe   : > { %s322_s15 = sshll.u32 %s454_s14, 2 }
   0xf   : > { %s166_s18 = scalar_lea.vmem %s449_s0, %s322_s15  ;;  %s172_s25 = scalar_lea.vmem %s452_s3, %s322_s15 }
  0x10   : > { %v346_v1 = vld [vmem:[%s166_s18] sm:$0xff]   ;;  %v381_v2 = vld [vmem:[%s166_s18 + $0x8] sm:$0xff]   ;;  %v382_v3 = vld [vmem:[%s166_s18 + $0x10] sm:$0xff]  }
  0x11   : > { %v347_v4 = vunpack.c.l.bf16 %v346_v1  ;;  %v348_v5 = vunpack.c.h.bf16 %v346_v1  ;;  %v351_v6 = vunpack.c.l.bf16 %v381_v2  ;;  %v352_v7 = vunpack.c.h.bf16 %v381_v2  ;;  %v383_v8 = vld [vmem:[%s166_s18 + $0x18] sm:$0xff]  }
  0x12   : > { %v355_v10 = vunpack.c.l.bf16 %v382_v3  ;;  %v356_v11 = vunpack.c.h.bf16 %v382_v3  ;;  %v359_v12 = vunpack.c.l.bf16 %v383_v8  ;;  %v360_v13 = vunpack.c.h.bf16 %v383_v8 }
  0x13   : > { %v197_v14 = vmul.f32 %v347_v4, %v325_v0  ;;  %v198_v15 = vmul.f32 %v348_v5, %v325_v0  ;;  %v199_v16 = vmul.f32 %v351_v6, %v325_v0  ;;  %v200_v17 = vmul.f32 %v352_v7, %v325_v0 }
  0x14   : > { %v201_v18 = vmul.f32 %v355_v10, %v325_v0  ;;  %v202_v19 = vmul.f32 %v356_v11, %v325_v0  ;;  %v203_v20 = vmul.f32 %v359_v12, %v325_v0  ;;  %v204_v21 = vmul.f32 %v360_v13, %v325_v0 }
  0x15   : > { %v212_v22 = vadd.f32 %v326_v9, %v197_v14  ;;  %v213_v23 = vadd.f32 %v326_v9, %v198_v15  ;;  %v214_v24 = vadd.f32 %v326_v9, %v199_v16  ;;  %v215_v25 = vadd.f32 %v326_v9, %v200_v17 }
  0x16   : > { %v216_v26 = vadd.f32 %v326_v9, %v201_v18  ;;  %v217_v27 = vadd.f32 %v326_v9, %v202_v19  ;;  %v218_v28 = vadd.f32 %v326_v9, %v203_v20  ;;  %v219_v29 = vadd.f32 %v326_v9, %v204_v21 }
  0x17   : > { %v364_v30 = vpack.c.bf16 %v213_v23, %v212_v22  ;;  %v369_v31 = vpack.c.bf16 %v215_v25, %v214_v24 }
  0x18   : > { %v374_v32 = vpack.c.bf16 %v217_v27, %v216_v26  ;;  %v379_v33 = vpack.c.bf16 %v219_v29, %v218_v28 }
  0x19   : > { %365 = vst [vmem:[%s172_s25] sm:$0xff] %v364_v30   ;;  %384 = vst [vmem:[%s172_s25 + $0x8] sm:$0xff] %v369_v31  }
  0x1a   : > { %385 = vst [vmem:[%s172_s25 + $0x10] sm:$0xff] %v374_v32   ;;  %386 = vst [vmem:[%s172_s25 + $0x18] sm:$0xff] %v379_v33  }
  0x1b PF: > { %s13_s12 = sadd.s32 1, %s401_s12  }
  0x1c   : > { %p10_p4 = scmp.ge.s32.totalorder %s13_s12, 4  }
  0x1e   :  { %12 = sbr.rel (!%p10_p4) target bundleno = 1 (0x1), region = 62 }

// kernel: residual_block_forward.11
= control target key start
LH: loop header
LB: loop body
LE: loop exit
PB: predicated region body
PF: predicated region fallthrough
CT: control target
= control target key end

     0   :  { %s471_s15 = smov 0   ;;  %s501_s0 = inlined_call_operand.vmem [shape: bf16[128,128], index: 0, kind: input, shape index: {}]   ;;  %s502_s1 = inlined_call_operand.vmem [shape: f32[1,128], index: 1, kind: input, shape index: {}]   ;;  %s503_s2 = inlined_call_operand.vmem [shape: f32[1,128], index: 2, kind: input, shape index: {}]   ;;  %s504_s3 = inlined_call_operand.vmem [shape: bf16[128,128], index: 3, kind: input, shape index: {}]   ;;  %s505_s4 = inlined_call_operand.vmem [shape: f32[128,128], index: 4, kind: output, shape index: {}]  }
   0x1 LB: > { %s377_s16 = sadd.s32 4294967295, %s444_s15   ;;  %p381_p0 = scmp.ge.s32.totalorder %s444_s15, 1  ;;  %s444_s15 = sphi %s471_s15, %s14_s15  }
   0x2   : > { %p174_p1 = scmp.lt.s32.totalorder %s444_s15, 3 }
   0x4   : > { %p175_p2 = pnand %p381_p0, %p174_p1 }
   0x5   : > { %s382_s17 = sshll.u32 (!%p175_p2), %s377_s16, 3  ;;  %v388_v0 = vld [vmem:[%s502_s1] ss:$0 sm:$0xff] (!%p175_p2) }
   0x6   : > { %178 = sbr.rel (%p175_p2) target bundleno = 35 (0x23), region = 36  ;;  %p206_p3 = scmp.lt.s32.totalorder (!%p175_p2), %s382_s17, 15  ;;  %v389_v11 = vld [vmem:[%s503_s2] ss:$0 sm:$0xff] (!%p175_p2) }
   0xd   : > { %s507_s17 = smov (!%p206_p3, %s382_s17), 15 }
   0xe   : > { %s383_s18 = sshll.u32 %s507_s17, 2  ;;  %s387_s29 = sshll.u32 %s507_s17, 3 }
   0xf   : > { %s209_s21 = scalar_lea.vmem %s501_s0, %s383_s18  ;;  %s215_s24 = scalar_lea.vmem %s504_s3, %s383_s18 }
  0x10   : > { %v393_v1 = vld [vmem:[%s209_s21] sm:$0xff]   ;;  %v424_v3 = vld [vmem:[%s209_s21 + $0x8] sm:$0xff]   ;;  %v425_v9 = vld [vmem:[%s209_s21 + $0x10] sm:$0xff]   ;;  %s221_s6 = scalar_lea.vmem %s505_s4, %s387_s29 }
  0x11   : > { %v409_v2 = vld [vmem:[%s215_s24] sm:$0xff]   ;;  %v394_v4 = vunpack.c.l.bf16 %v393_v1  ;;  %v395_v6 = vunpack.c.h.bf16 %v393_v1  ;;  %v427_v8 = vld [vmem:[%s215_s24 + $0x8] sm:$0xff]   ;;  %v428_v10 = vld [vmem:[%s215_s24 + $0x10] sm:$0xff]   ;;  %v398_v12 = vunpack.c.l.bf16 %v424_v3  ;;  %v399_v14 = vunpack.c.h.bf16 %v424_v3 }
  0x12   : > { %v410_v5 = vunpack.c.l.bf16 %v409_v2  ;;  %v411_v7 = vunpack.c.h.bf16 %v409_v2  ;;  %v414_v13 = vunpack.c.l.bf16 %v427_v8  ;;  %v415_v15 = vunpack.c.h.bf16 %v427_v8  ;;  %v426_v16 = vld [vmem:[%s209_s21 + $0x18] sm:$0xff]  }
  0x13   : > { %v246_v17 = vmul.f32 %v394_v4, %v388_v0  ;;  %v247_v18 = vmul.f32 %v395_v6, %v388_v0  ;;  %v402_v19 = vunpack.c.l.bf16 %v425_v9  ;;  %v418_v20 = vunpack.c.l.bf16 %v428_v10  ;;  %v429_v21 = vld [vmem:[%s215_s24 + $0x18] sm:$0xff]  }
  0x14   : > { %v248_v22 = vmul.f32 %v398_v12, %v388_v0  ;;  %v249_v23 = vmul.f32 %v399_v14, %v388_v0  ;;  %v403_v24 = vunpack.c.h.bf16 %v425_v9  ;;  %v419_v25 = vunpack.c.h.bf16 %v428_v10 }
  0x15   : > { %v261_v26 = vadd.f32 %v389_v11, %v246_v17  ;;  %v262_v27 = vadd.f32 %v389_v11, %v247_v18  ;;  %v250_v28 = vmul.f32 %v402_v19, %v388_v0  ;;  %v406_v29 = vunpack.c.l.bf16 %v426_v16 }
  0x16   : > { %v263_v30 = vadd.f32 %v389_v11, %v248_v22  ;;  %v264_v31 = vadd.f32 %v389_v11, %v249_v23  ;;  %v251_v32 = vmul.f32 %v403_v24, %v388_v0  ;;  %v422_v33 = vunpack.c.l.bf16 %v429_v21 }
  0x17   : > { %v285_v34 = vadd.f32 %v410_v5, %v261_v26  ;;  %v286_v35 = vadd.f32 %v411_v7, %v262_v27  ;;  %v265_v36 = vadd.f32 %v389_v11, %v250_v28  ;;  %v252_v37 = vmul.f32 %v406_v29, %v388_v0 }
  0x18   : > { %v287_v38 = vadd.f32 %v414_v13, %v263_v30  ;;  %v288_v39 = vadd.f32 %v415_v15, %v264_v31  ;;  %v266_v40 = vadd.f32 %v389_v11, %v251_v32  ;;  %v407_v41 = vunpack.c.h.bf16 %v426_v16 }
  0x19   : > { %v293_v42 = vmax.f32 %v285_v34, 0.0  ;;  %v294_v43 = vmax.f32 %v286_v35, 0.0  ;;  %v289_v44 = vadd.f32 %v418_v20, %v265_v36  ;;  %v267_v45 = vadd.f32 %v389_v11, %v252_v37 }
  0x1a   : > { %v295_v46 = vmax.f32 %v287_v38, 0.0  ;;  %v296_v47 = vmax.f32 %v288_v39, 0.0  ;;  %v290_v48 = vadd.f32 %v419_v25, %v266_v40  ;;  %v253_v49 = vmul.f32 %v407_v41, %v388_v0 }
  0x1b   : > { %301 = vst [vmem:[%s221_s6] sm:$0xff] %v293_v42  ;;  %302 = vst [vmem:[%s221_s6 + $0x8] sm:$0xff] %v294_v43  ;;  %v297_v50 = vmax.f32 %v289_v44, 0.0  ;;  %v291_v51 = vadd.f32 %v422_v33, %v267_v45  ;;  %v423_v52 = vunpack.c.h.bf16 %v429_v21 }
  0x1c   : > { %303 = vst [vmem:[%s221_s6 + $0x10] sm:$0xff] %v295_v46  ;;  %304 = vst [vmem:[%s221_s6 + $0x18] sm:$0xff] %v296_v47  ;;  %v298_v53 = vmax.f32 %v290_v48, 0.0  ;;  %v268_v54 = vadd.f32 %v389_v11, %v253_v49 }
  0x1d   : > { %305 = vst [vmem:[%s221_s6 + $0x20] sm:$0xff] %v297_v50  ;;  %v299_v55 = vmax.f32 %v291_v51, 0.0 }
  0x1e   : > { %306 = vst [vmem:[%s221_s6 + $0x28] sm:$0xff] %v298_v53  ;;  %v292_v56 = vadd.f32 %v423_v52, %v268_v54 }
  0x1f   : > { %307 = vst [vmem:[%s221_s6 + $0x30] sm:$0xff] %v299_v55 }
  0x20   : > { %v300_v57 = vmax.f32 %v292_v56, 0.0 }
  0x22   : > { %308 = vst [vmem:[%s221_s6 + $0x38] sm:$0xff] %v300_v57 }
  0x23 PF: > { %s14_s15 = sadd.s32 1, %s444_s15  }
  0x24   : > { %p11_p4 = scmp.ge.s32.totalorder %s14_s15, 4  }
  0x26   :  { %13 = sbr.rel (!%p11_p4) target bundleno = 1 (0x1), region = 69 }

</bundles_post_ra>
